<compile_context>
chip_gen: v7x
topology: tpu7x:2x2x1
jax: 0.10.0
libtpu: 0.0.40
codegen_flags: <defaults>
</compile_context>

<pallas_src>
import jax
import jax.numpy as jnp
from jax.experimental import pallas as pl
from jax.experimental.pallas import tpu as pltpu

C, L, P, H, K, PAD = 4, 16, 3, 32, 3, 1  # channels, length, param dim, hidden, kernel, padding
KC = K * C                               # im2col feature width = 12
TB_MAX = 512                             # batch tile (multiple of 128 -> all blocks tile cleanly)


def ratio_estimator_kernel(x_ref, p_ref, w2_ref, bc_ref, wpt_ref, bp_ref,
                           wot_ref, wop_ref, bo_ref, out_ref):
    # x_ref  : [TB*L, K*C]  im2col'd sample windows, rows ordered (batch, position)
    # p_ref  : [TB, P]      parameter part of x
    # w2_ref : [K*C, H]     Conv1d weight reshaped so the conv is one matmul
    # bc_ref : [1, H]       Conv1d bias
    # wpt_ref: [P, H]       param Linear weight (transposed)
    # bp_ref : [1, H]       param Linear bias
    # wot_ref: [1, H]       output weight, sample-encoder half
    # wop_ref: [1, H]       output weight, param-encoder half
    # bo_ref : [1, 1]       output bias
    # out_ref: [TB, 1]
    tb = p_ref.shape[0]

    # ---- sample encoder: Conv1d(C->H, k=3, pad=1) as ONE im2col matmul ----
    conv = jnp.dot(x_ref[...], w2_ref[...],
                   preferred_element_type=jnp.float32)                 # [TB*L, H]
    act = jnp.maximum(conv + bc_ref[...], 0.0)                         # [TB*L, H]
    enc_t = jnp.mean(act.reshape(tb, L, H), axis=1)                    # [TB, H]

    # ---- param encoder: Linear(P->H) + ReLU ----
    enc_p = jnp.maximum(
        jnp.dot(p_ref[...], wpt_ref[...],
                preferred_element_type=jnp.float32) + bp_ref[...],
        0.0)                                                           # [TB, H]

    # ---- output layer, concat-free: cat([t,p]) @ W.T == t@Wt.T + p@Wp.T ----
    proj = enc_t * wot_ref[...] + enc_p * wop_ref[...]                 # [TB, H] (VPU)
    out_ref[...] = jnp.sum(proj, axis=1, keepdims=True) + bo_ref[...]  # [TB, 1]


def ratio_estimator_forward(x, params):
    """x: [B, C*L + P] float32 -> [B, 1] float32 (matches the PyTorch forward)."""
    wc, bc, wp, bp, wo, bo = params
    B = x.shape[0]
    # PyTorch: t = x[:, :-P].view(-1, C, L); p = x[:, -P:]
    t = x[:, :C * L].reshape(B, C, L)
    p = x[:, C * L:]

    # One-shot im2col in the wrapper: kernel gets a single contiguous operand.
    # x2[b*L + l, k*C + c] = t_pad[b, c, l + k]
    t_pad = jnp.pad(t, ((0, 0), (0, 0), (PAD, PAD)))                     # [B, C, L+2]
    wins = jnp.stack([t_pad[:, :, k:k + L] for k in range(K)], axis=-1)  # [B, C, L, K]
    x2 = jnp.transpose(wins, (0, 2, 3, 1)).reshape(B * L, KC)            # [B*L, K*C]
    # w2[k*C + c, h] = wc[h, c, k]
    w2 = jnp.transpose(wc, (2, 1, 0)).reshape(KC, H)                     # [K*C, H]

    # Batch tiling: a single full-array block for small B; 512-row tiles
    # (double-buffered, "parallel" so v7x can shard across cores) for large B.
    if B <= TB_MAX:
        tb, b_rows, grid = B, B, 1
    else:
        tb = TB_MAX
        b_rows = pl.cdiv(B, tb) * tb
        grid = b_rows // tb
        x2 = jnp.pad(x2, ((0, (b_rows - B) * L), (0, 0)))
        p = jnp.pad(p, ((0, b_rows - B), (0, 0)))

    out = pl.pallas_call(
        ratio_estimator_kernel,
        grid=(grid,),
        in_specs=[
            pl.BlockSpec((tb * L, KC), lambda i: (i, 0)),   # im2col, tiled on batch
            pl.BlockSpec((tb, P), lambda i: (i, 0)),        # params, tiled on batch
            pl.BlockSpec((KC, H), lambda i: (0, 0)),        # weights: VMEM-resident
            pl.BlockSpec((1, H), lambda i: (0, 0)),
            pl.BlockSpec((P, H), lambda i: (0, 0)),
            pl.BlockSpec((1, H), lambda i: (0, 0)),
            pl.BlockSpec((1, H), lambda i: (0, 0)),
            pl.BlockSpec((1, H), lambda i: (0, 0)),
            pl.BlockSpec((1, 1), lambda i: (0, 0)),
        ],
        out_specs=pl.BlockSpec((tb, 1), lambda i: (i, 0)),
        out_shape=jax.ShapeDtypeStruct((b_rows, 1), jnp.float32),
        compiler_params=pltpu.CompilerParams(
            dimension_semantics=("parallel",)),
    )(x2, p, w2, bc.reshape(1, H), wp.T, bp.reshape(1, H),
      wo[:, :H], wo[:, H:], bo.reshape(1, 1))
    return out[:B]


def reference_forward(x, params):
    """Pure-JAX reference mirroring the PyTorch semantics."""
    wc, bc, wp, bp, wo, bo = params
    B = x.shape[0]
    t = x[:, :C * L].reshape(B, C, L)
    p = x[:, C * L:]
    tp = jnp.pad(t, ((0, 0), (0, 0), (PAD, PAD)))
    conv = jnp.zeros((B, H, L), jnp.float32)
    for k in range(K):
        conv = conv + jnp.einsum('hc,bcl->bhl', wc[:, :, k], tp[:, :, k:k + L])
    conv = conv + bc[None, :, None]
    enc_t = jnp.mean(jax.nn.relu(conv), axis=-1)                 # [B, H]
    enc_p = jax.nn.relu(p @ wp.T + bp)                           # [B, H]
    cat = jnp.concatenate([enc_t, enc_p], axis=1)                # [B, 2H]
    return cat @ wo.T + bo                                       # [B, 1]


def init_params(key):
    ks = jax.random.split(key, 6)
    wc = jax.random.normal(ks[0], (H, C, K), jnp.float32) * 0.1  # Conv1d weight
    bc = jax.random.normal(ks[1], (H,), jnp.float32) * 0.1       # Conv1d bias
    wp = jax.random.normal(ks[2], (H, P), jnp.float32) * 0.1     # param Linear weight
    bp = jax.random.normal(ks[3], (H,), jnp.float32) * 0.1       # param Linear bias
    wo = jax.random.normal(ks[4], (1, 2 * H), jnp.float32) * 0.1 # output Linear weight
    bo = jax.random.normal(ks[5], (1,), jnp.float32) * 0.1       # output Linear bias
    return wc, bc, wp, bp, wo, bo


if __name__ == "__main__":
    key = jax.random.PRNGKey(0)
    k_x, k_p = jax.random.split(key)
    B = 2
    x = jax.random.normal(k_x, (B, C * L + P), jnp.float32)      # [2, 67]
    params = init_params(k_p)

    out = jax.block_until_ready(jax.jit(ratio_estimator_forward)(x, params))
    ref = jax.block_until_ready(reference_forward(x, params))

    assert out.shape == (B, 1)
    assert jnp.allclose(out, ref, atol=1e-5, rtol=1e-5), (out, ref)
    print("KERNEL_OK")
</pallas_src>

<mosaic_0001>
module attributes {stable_mosaic.version = 11 : i64} {
  func.func @ratio_estimator_kernel(%arg0: i32, %arg1: memref<32x12xf32, #tpu.memory_space<vmem>>, %arg2: memref<2x3xf32, #tpu.memory_space<vmem>>, %arg3: memref<12x32xf32, #tpu.memory_space<vmem>>, %arg4: memref<1x32xf32, #tpu.memory_space<vmem>>, %arg5: memref<3x32xf32, #tpu.memory_space<vmem>>, %arg6: memref<1x32xf32, #tpu.memory_space<vmem>>, %arg7: memref<1x32xf32, #tpu.memory_space<vmem>>, %arg8: memref<1x32xf32, #tpu.memory_space<vmem>>, %arg9: memref<1x1xf32, #tpu.memory_space<vmem>>, %arg10: memref<2x1xf32, #tpu.memory_space<vmem>>) attributes {dimension_semantics = [#tpu.dimension_semantics<parallel>], iteration_bounds = array<i64: 1>, scalar_prefetch = 0 : i64, scratch_operands = 0 : i64, tpu.core_type = #tpu.core_type<tc>, window_params = [{transform_indices = @transform_0, window_bounds = array<i64: 32, 12>}, {transform_indices = @transform_1, window_bounds = array<i64: 2, 3>}, {pipeline_mode = #tpu.pipeline_mode<synchronous>, transform_indices = @transform_2, window_bounds = array<i64: 12, 32>}, {pipeline_mode = #tpu.pipeline_mode<synchronous>, transform_indices = @transform_3, window_bounds = array<i64: 1, 32>}, {pipeline_mode = #tpu.pipeline_mode<synchronous>, transform_indices = @transform_4, window_bounds = array<i64: 3, 32>}, {pipeline_mode = #tpu.pipeline_mode<synchronous>, transform_indices = @transform_5, window_bounds = array<i64: 1, 32>}, {pipeline_mode = #tpu.pipeline_mode<synchronous>, transform_indices = @transform_6, window_bounds = array<i64: 1, 32>}, {pipeline_mode = #tpu.pipeline_mode<synchronous>, transform_indices = @transform_7, window_bounds = array<i64: 1, 32>}, {pipeline_mode = #tpu.pipeline_mode<synchronous>, transform_indices = @transform_8, window_bounds = array<i64: 1, 1>}, {transform_indices = @transform_9, window_bounds = array<i64: 2, 1>}]} {
    %c0 = arith.constant 0 : index
    %c0_0 = arith.constant 0 : index
    %0 = vector.load %arg1[%c0, %c0_0] : memref<32x12xf32, #tpu.memory_space<vmem>>, vector<32x12xf32>
    %c0_1 = arith.constant 0 : index
    %c0_2 = arith.constant 0 : index
    %1 = vector.load %arg3[%c0_1, %c0_2] : memref<12x32xf32, #tpu.memory_space<vmem>>, vector<12x32xf32>
    %cst = arith.constant dense<0.000000e+00> : vector<32x32xf32>
    %2 = tpu.matmul %0, %1, %cst {dimension_numbers = #tpu.dot_dimension_numbers<[1], [0], [0], [1], [0, 0, 1, 1], [], []>} : vector<32x12xf32>, vector<12x32xf32>, vector<32x32xf32> -> vector<32x32xf32>
    %c0_3 = arith.constant 0 : index
    %c0_4 = arith.constant 0 : index
    %3 = vector.load %arg4[%c0_3, %c0_4] : memref<1x32xf32, #tpu.memory_space<vmem>>, vector<1x32xf32>
    %4 = vector.broadcast %3 : vector<1x32xf32> to vector<32x32xf32>
    %5 = arith.addf %2, %4 : vector<32x32xf32>
    %cst_5 = arith.constant 0.000000e+00 : f32
    %6 = vector.broadcast %cst_5 : f32 to vector<32x32xf32>
    %7 = arith.maximumf %5, %6 : vector<32x32xf32>
    %8 = vector.shape_cast %7 : vector<32x32xf32> to vector<2x16x32xf32>
    %cst_6 = arith.constant dense<0.000000e+00> : vector<2x32xf32>
    %9 = vector.multi_reduction <add>, %8, %cst_6 [1] : vector<2x16x32xf32> to vector<2x32xf32>
    %cst_7 = arith.constant 1.600000e+01 : f32
    %10 = vector.broadcast %cst_7 : f32 to vector<2x32xf32>
    %11 = arith.divf %9, %10 : vector<2x32xf32>
    %c0_8 = arith.constant 0 : index
    %c0_9 = arith.constant 0 : index
    %12 = vector.load %arg2[%c0_8, %c0_9] : memref<2x3xf32, #tpu.memory_space<vmem>>, vector<2x3xf32>
    %c0_10 = arith.constant 0 : index
    %c0_11 = arith.constant 0 : index
    %13 = vector.load %arg5[%c0_10, %c0_11] : memref<3x32xf32, #tpu.memory_space<vmem>>, vector<3x32xf32>
    %cst_12 = arith.constant dense<0.000000e+00> : vector<2x32xf32>
    %14 = tpu.matmul %12, %13, %cst_12 {dimension_numbers = #tpu.dot_dimension_numbers<[1], [0], [0], [1], [0, 0, 1, 1], [], []>} : vector<2x3xf32>, vector<3x32xf32>, vector<2x32xf32> -> vector<2x32xf32>
    %c0_13 = arith.constant 0 : index
    %c0_14 = arith.constant 0 : index
    %15 = vector.load %arg6[%c0_13, %c0_14] : memref<1x32xf32, #tpu.memory_space<vmem>>, vector<1x32xf32>
    %16 = vector.broadcast %15 : vector<1x32xf32> to vector<2x32xf32>
    %17 = arith.addf %14, %16 : vector<2x32xf32>
    %cst_15 = arith.constant 0.000000e+00 : f32
    %18 = vector.broadcast %cst_15 : f32 to vector<2x32xf32>
    %19 = arith.maximumf %17, %18 : vector<2x32xf32>
    %c0_16 = arith.constant 0 : index
    %c0_17 = arith.constant 0 : index
    %20 = vector.load %arg7[%c0_16, %c0_17] : memref<1x32xf32, #tpu.memory_space<vmem>>, vector<1x32xf32>
    %21 = vector.broadcast %20 : vector<1x32xf32> to vector<2x32xf32>
    %22 = arith.mulf %11, %21 : vector<2x32xf32>
    %c0_18 = arith.constant 0 : index
    %c0_19 = arith.constant 0 : index
    %23 = vector.load %arg8[%c0_18, %c0_19] : memref<1x32xf32, #tpu.memory_space<vmem>>, vector<1x32xf32>
    %24 = vector.broadcast %23 : vector<1x32xf32> to vector<2x32xf32>
    %25 = arith.mulf %19, %24 : vector<2x32xf32>
    %26 = arith.addf %22, %25 : vector<2x32xf32>
    %cst_20 = arith.constant dense<0.000000e+00> : vector<2xf32>
    %27 = vector.multi_reduction <add>, %26, %cst_20 [1] : vector<2x32xf32> to vector<2xf32>
    %28 = vector.shape_cast %27 : vector<2xf32> to vector<2x1xf32>
    %c0_21 = arith.constant 0 : index
    %c0_22 = arith.constant 0 : index
    %29 = vector.load %arg9[%c0_21, %c0_22] : memref<1x1xf32, #tpu.memory_space<vmem>>, vector<1x1xf32>
    %30 = vector.broadcast %29 : vector<1x1xf32> to vector<2x1xf32>
    %31 = arith.addf %28, %30 : vector<2x1xf32>
    %c0_23 = arith.constant 0 : index
    %c0_24 = arith.constant 0 : index
    %32 = vector.load %arg10[%c0_23, %c0_24] : memref<2x1xf32, #tpu.memory_space<vmem>>, vector<2x1xf32>
    tpu.vector_store %arg10[%c0_23, %c0_24], %31 {strides = array<i32>} : memref<2x1xf32, #tpu.memory_space<vmem>>, vector<2x1xf32>,
    return
  }
  func.func @transform_0(%arg0: i32) -> (i32, i32) {
    %c0_i32 = arith.constant 0 : i32
    %c0_i32_0 = arith.constant 0 : i32
    return %arg0, %c0_i32 : i32, i32
  }
  func.func @transform_1(%arg0: i32) -> (i32, i32) {
    %c0_i32 = arith.constant 0 : i32
    %c0_i32_0 = arith.constant 0 : i32
    return %arg0, %c0_i32 : i32, i32
  }
  func.func @transform_2(%arg0: i32) -> (i32, i32) {
    %c0_i32 = arith.constant 0 : i32
    %c0_i32_0 = arith.constant 0 : i32
    %c0_i32_1 = arith.constant 0 : i32
    return %c0_i32, %c0_i32_0 : i32, i32
  }
  func.func @transform_3(%arg0: i32) -> (i32, i32) {
    %c0_i32 = arith.constant 0 : i32
    %c0_i32_0 = arith.constant 0 : i32
    %c0_i32_1 = arith.constant 0 : i32
    return %c0_i32, %c0_i32_0 : i32, i32
  }
  func.func @transform_4(%arg0: i32) -> (i32, i32) {
    %c0_i32 = arith.constant 0 : i32
    %c0_i32_0 = arith.constant 0 : i32
    %c0_i32_1 = arith.constant 0 : i32
    return %c0_i32, %c0_i32_0 : i32, i32
  }
  func.func @transform_5(%arg0: i32) -> (i32, i32) {
    %c0_i32 = arith.constant 0 : i32
    %c0_i32_0 = arith.constant 0 : i32
    %c0_i32_1 = arith.constant 0 : i32
    return %c0_i32, %c0_i32_0 : i32, i32
  }
  func.func @transform_6(%arg0: i32) -> (i32, i32) {
    %c0_i32 = arith.constant 0 : i32
    %c0_i32_0 = arith.constant 0 : i32
    %c0_i32_1 = arith.constant 0 : i32
    return %c0_i32, %c0_i32_0 : i32, i32
  }
  func.func @transform_7(%arg0: i32) -> (i32, i32) {
    %c0_i32 = arith.constant 0 : i32
    %c0_i32_0 = arith.constant 0 : i32
    %c0_i32_1 = arith.constant 0 : i32
    return %c0_i32, %c0_i32_0 : i32, i32
  }
  func.func @transform_8(%arg0: i32) -> (i32, i32) {
    %c0_i32 = arith.constant 0 : i32
    %c0_i32_0 = arith.constant 0 : i32
    %c0_i32_1 = arith.constant 0 : i32
    return %c0_i32, %c0_i32_0 : i32, i32
  }
  func.func @transform_9(%arg0: i32) -> (i32, i32) {
    %c0_i32 = arith.constant 0 : i32
    %c0_i32_0 = arith.constant 0 : i32
    return %arg0, %c0_i32 : i32, i32
  }
}

</mosaic_0001>

<bundles_post_ra>
// kernel: ratio_estimator_forward.1
= control target key start
LH: loop header
LB: loop body
LE: loop exit
PB: predicated region body
PF: predicated region fallthrough
CT: control target
= control target key end

     0   :  { %vm60_vm0 = vcmask 1043456   ;;  %vm47_vm1 = vcmask 97280   ;;  %vm354_vm2 = vmmov 1   ;;  %v355_v2 = vmov 0.0   ;;  %s457_s2 = inlined_call_operand.vmem [shape: f32[12,32], index: 2, kind: input, shape index: {}]   ;;  %s458_s0 = inlined_call_operand.vmem [shape: f32[32,12], index: 0, kind: input, shape index: {}]   ;;  %s459_s4 = inlined_call_operand.vmem [shape: f32[3,32], index: 4, kind: input, shape index: {}]   ;;  %s460_s1 = inlined_call_operand.vmem [shape: f32[2,3], index: 1, kind: input, shape index: {}]   ;;  %s461_s8 = inlined_call_operand.<no memory space> [shape: f32[1,1], index: 8, kind: input, shape index: {}]   ;;  %s462_s3 = inlined_call_operand.vmem [shape: f32[1,32], index: 3, kind: input, shape index: {}]   ;;  %s463_s5 = inlined_call_operand.vmem [shape: f32[1,32], index: 5, kind: input, shape index: {}]   ;;  %s464_s7 = inlined_call_operand.vmem [shape: f32[1,32], index: 7, kind: input, shape index: {}]   ;;  %s465_s6 = inlined_call_operand.vmem [shape: f32[1,32], index: 6, kind: input, shape index: {}]   ;;  %s466_s9 = inlined_call_operand.vmem [shape: f32[2,1], index: 9, kind: output, shape index: {}]  }
   0x1   :  { %v38_v0 = vld [vmem:[%s457_s2] sm:$0xff]  ;;  %v39_v1 = vld [vmem:[%s457_s2 + $0x8] sm:$0xf]  ;;  %vm346_vm3 = vmpackc.low %vm60_vm0, %vm354_vm2  ;;  %340 = vmatprep.subr.mxu1 %v355_v2  ;;  %vm188_vm4 = vcmask 1042432   ;;  %vm356_vm5 = vmmov 0   ;;  %vm184_vm6 = vcmask 23552   ;;  %v14_v10 = vstv %s461_s8 }
   0x2   :  { %v345_v3 = vpack.c.bf16 %v39_v1, %v38_v0  ;;  %v34_v4 = vld [vmem:[%s458_s0] sm:$0xff]  ;;  %342 = vmatprep.mubr.msk.f32.mxu1 %vm356_vm5, %v355_v2  ;;  %v35_v7 = vld [vmem:[%s458_s0 + $0x8] sm:$0xff]  ;;  %v36_v8 = vld [vmem:[%s458_s0 + $0x10] sm:$0xff]  ;;  %15 = vst [vmem:[#allocation2] sm:$0x1] %v14_v10  ;;  %vm153_vm7 = vcmask 261120  }
   0x3   :  { %334 = vmatprep.mubr.msk.f32.mxu0 %vm47_vm1, %v34_v4  ;;  %v176_v5 = vld [vmem:[%s459_s4] sm:$0x7]  ;;  %v37_v9 = vld [vmem:[%s458_s0 + $0x18] sm:$0xff]  ;;  %vm289_vm8 = vcmask 1041409   ;;  %vm292_vm9 = vcmask 254976   ;;  %vm304_vm10 = vcmask 1024  }
   0x4   :  { %v175_v6 = vld [vmem:[%s460_s1] sm:$0x3]  ;;  %347 = vmatprep.subr.msk.bf16.mxu0 %vm346_vm3, %v345_v3  ;;  %341 = vmatpush3.msk.msra.mxu1 %vm188_vm4, %v176_v5 }
   0x5   :  { %350 = vmatpush3.bf16.msk.msra.mxu0 %vm346_vm3, %v345_v3  ;;  %343 = vmatmul.mubr.msk.f32.vlgmr.msra.gmra.mrb[0].mxu1 %vm184_vm6, %v175_v6  ;;  %v310_v12 = vld [vmem:[%s462_s3] ss:$0 sm:$0xff] }
   0x6   :  { %v316_v32 = vld [vmem:[%s463_s5] ss:$0 sm:$0xff] }
   0x7   :  { %v320_v43 = vld [vmem:[%s464_s7] ss:$0 sm:$0xff] }
   0x8   :  { %335 = vmatmul.mubr.msk.f32.vlgmr.msra.gmra.mrb[0].mxu0 %vm47_vm1, %v35_v7  ;;  %v319_v46 = vld [vmem:[%s465_s6] ss:$0 sm:$0xff] }
   0x9   :  { %337 = vmatprep.mubr.msk.f32.mxu0 %vm47_vm1, %v36_v8  ;;  %v321_v60 = vld [vmem:[#allocation2] ss:$0 sm:$0xff] }
   0xc   :  { %338 = vmatmul.mubr.msk.f32.gmra.mrb[2].mxu0 %vm47_vm1, %v37_v9 }
  0xd8   :  { %v258_v11 = vpop.f32.mrb[0].mxu1 }
  0xd9   :  { %v344_v13 = vpop.f32.mrb[1].mxu1  ;;  %v259_v37 = vadd.f32 %v316_v32, %v258_v11 }
  0xdb   :  { %v336_v14 = vpop.f32.mrb[0].mxu0  ;;  %v262_v42 = vmax.f32 %v259_v37, 0.0 }
  0xdc   :  { %v136_v15 = vadd.f32 %v336_v14, %v310_v12  ;;  %v130_v16 = vpop.f32.mrb[1].mxu0 }
  0xdd   :  { %v131_v17 = vadd.f32 %v310_v12, %v130_v16  ;;  %v279_v49 = vmul.f32 %v320_v43, %v262_v42 }
  0xde   :  { %v150_v18 = vmax.f32 %v136_v15, 0.0 }
  0xdf   :  { %v149_v19 = vmax.f32 %v131_v17, 0.0  ;;  %v339_v20 = vpop.f32.mrb[2].mxu0  ;;  %v281_v52 = vrot.slane %v279_v49, 1 }
  0xe0   :  { %v155_v21 = vsel %vm153_vm7, %v150_v18, 0.0  ;;  %v146_v22 = vadd.f32 %v339_v20, %v310_v12  ;;  %v140_v23 = vpop.f32.mrb[3].mxu0 }
  0xe1   :  { %v154_v24 = vsel %vm153_vm7, %v149_v19, 0.0  ;;  %v141_v25 = vadd.f32 %v310_v12, %v140_v23 }
  0xe2   :  { %v156_v26 = vadd.f32 %v155_v21, %v154_v24  ;;  %v152_v27 = vmax.f32 %v146_v22, 0.0 }
  0xe3   :  { %v151_v28 = vmax.f32 %v141_v25, 0.0 }
  0xe4   :  { %v157_v29 = vrot.slane %v156_v26, 4  ;;  %v164_v30 = vsel %vm153_vm7, %v152_v27, 0.0 }
  0xe5   :  { %v163_v31 = vsel %vm153_vm7, %v151_v28, 0.0 }
  0xe6   :  { %v158_v33 = vadd.f32 %v157_v29, %v156_v26  ;;  %v165_v34 = vadd.f32 %v164_v30, %v163_v31 }
  0xe8   :  { %v159_v35 = vrot.slane %v158_v33, 2  ;;  %v166_v36 = vrot.slane %v165_v34, 4 }
  0xea   :  { %v160_v38 = vadd.f32 %v159_v35, %v158_v33  ;;  %v167_v39 = vadd.f32 %v166_v36, %v165_v34 }
  0xec   :  { %v161_v40 = vrot.slane %v160_v38, 1  ;;  %v168_v41 = vrot.slane %v167_v39, 2 }
  0xee   :  { %v169_v44 = vadd.f32 %v168_v41, %v167_v39  ;;  %v162_v45 = vadd.f32 %v161_v40, %v160_v38 }
  0xf0   :  { %v170_v47 = vrot.slane %v169_v44, 1  ;;  %v173_v48 = vmul.f32 0.0625, %v162_v45 }
  0xf2   :  { %v171_v50 = vadd.f32 %v170_v47, %v169_v44  ;;  %v270_v51 = vmul.f32 %v319_v46, %v173_v48 }
  0xf4   :  { %v284_v53 = vadd.f32 %v279_v49, %v270_v51  ;;  %v174_v54 = vmul.f32 0.0625, %v171_v50 }
  0xf6   :  { %v271_v55 = vmul.f32 %v319_v46, %v174_v54 }
  0xf8   :  { %v285_v56 = vadd.f32 %v281_v52, %v271_v55 }
  0xfa   :  { %v288_v57 = vrot.slane %v285_v56, 7 }
  0xfc   :  { %v290_v58 = vsel %vm289_vm8, %v288_v57, %v284_v53 }
  0xfd   :  { %v293_v59 = vsel %vm292_vm9, %v290_v58, 0.0 }
  0xfe   :  { %294 = vadd.xlane.f32.xlu0 %v293_v59 }
 0x18b   :  { %v295_v61 = vpop.xlane.xlu0 %294 }
 0x18c   :  { %v303_v62 = vadd.f32 %v321_v60, %v295_v61 }
 0x18e   :  { %305 = vst.msk [vmem:[%s466_s9] sm:$0x3] %vm304_vm10, %v303_v62 }

</bundles_post_ra>
